<compile_context>
chip_gen: v5e
topology: v5e:2x2
jax: 0.10.0
libtpu: 0.0.40
codegen_flags: <defaults>
</compile_context>

<pallas_src>
import functools

import jax
import jax.numpy as jnp
from jax import lax
from jax.experimental import pallas as pl
from jax.experimental.pallas import tpu as pltpu


# ----------------------------------------------------------------------------
# Pallas kernel: fused (conv1x1 -> BN(bias) -> ReLU) x 2 + running max over samples
# ----------------------------------------------------------------------------
def _mlp_maxpool_kernel(x_ref, w1_ref, b1_ref, w2_ref, b2_ref, out_ref):
    ts, tm, c0 = x_ref.shape

    # One weight-stationary MXU pass per layer with M = ts*tm fused rows.
    # Collapsing (ts, tm, c0) -> (ts*tm, c0) is layout-free: tm is a multiple of 16
    # (bf16 sublane tile), so no relayout/copy is emitted.
    x = x_ref[...].reshape(ts * tm, c0)
    h = jnp.dot(x, w1_ref[...], preferred_element_type=jnp.float32)
    h = jnp.maximum(h + b1_ref[...], 0.0)
    h = jnp.dot(h.astype(w2_ref.dtype), w2_ref[...],
                preferred_element_type=jnp.float32)
    h = jnp.maximum(h + b2_ref[...], 0.0)                       # (ts*tm, c2p) f32

    # Running max over the ts sample slabs; each slice starts at a multiple of tm
    # (sublane-aligned) so this is plain VPU work on data already in vregs.
    # 0 is a valid identity: every layer ends in ReLU, so pooled values are >= 0.
    acc = jnp.where(pl.program_id(1) == 0,
                    jnp.zeros(out_ref.shape, out_ref.dtype),
                    out_ref[...])
    for j in range(ts):
        acc = jnp.maximum(acc, lax.slice_in_dim(h, j * tm, (j + 1) * tm, axis=0))
    out_ref[...] = acc


# ----------------------------------------------------------------------------
# Generation-aware VMEM budget + tile selection
# ----------------------------------------------------------------------------
def _lane_pad(c):
    return pl.cdiv(c, 128) * 128


def _tpu_generation():
    """Returns (vmem_budget_bytes, vmem_limit_bytes_or_None, two_tensorcores)."""
    try:
        kind = jax.devices()[0].device_kind.lower()
    except Exception:
        kind = ""
    if "v5" in kind or "v6" in kind:
        return 96 << 20, 96 << 20, False      # 128 MiB physical VMEM, 1 TC per chip
    if "v7" in kind or "7x" in kind:
        return 44 << 20, 44 << 20, True       # 64 MiB physical VMEM, 2 TCs per chip
    return 14 << 20, None, True               # unknown: stay under any default scoped limit


def _choose_tiles(m_total, nsample, c0, c1, c2, *, vmem_budget, two_cores):
    """(tm, ts): tm points per block (multiple of 16), ts samples fused per grid step."""
    ts = max(d for d in range(1, min(16, nsample) + 1) if nsample % d == 0)
    c0p, c1p, c2p = _lane_pad(c0), _lane_pad(c1), _lane_pad(c2)

    def footprint(tm):
        return (2 * ts * tm * c0p * 2               # x block (bf16, double-buffered)
                + 2 * tm * c2p * 4                  # out block (f32, double-buffered)
                + 2 * (c0p * c1 + c1p * c2p) * 2    # weights (bf16, double-buffered)
                + 2 * 8 * (c1p + c2p) * 4           # biases (8-sublane padded, f32)
                + ts * tm * (c1p + c2p) * 4)        # in-kernel f32 intermediates h1, h2

    m_pad16 = pl.cdiv(m_total, 16) * 16
    cap = 512
    if two_cores:  # only v7x (2 TCs) needs >= 2 point tiles per core; v5e/v6e get fat tiles
        cap = min(cap, max(16, (m_total // 4 // 16) * 16))
    cap = min(cap, m_pad16)

    tm = 16
    for cand in range(16, cap + 1, 16):  # bf16-friendly multiples of 16
        if footprint(cand) <= vmem_budget:
            tm = cand
    return tm, ts


def mlp_maxpool(x_smc, params, *, tm, ts, vmem_limit_bytes):
    """x_smc: (nsample, M, C0) sample-major bf16. Returns (M, C_last) f32, max over samples."""
    (w1, b1), (w2, b2) = params
    nsample, m_total, c0 = x_smc.shape
    c1 = w1.shape[1]
    c2 = w2.shape[1]
    assert nsample % ts == 0

    # Lane-dense output stores: pad the final channel dim to a multiple of 128.
    # Padded channels compute relu(0 + 0) = 0 and are sliced off below.
    c2p = _lane_pad(c2)
    if c2p != c2:
        w2 = jnp.pad(w2, ((0, 0), (0, c2p - c2)))
        b2 = jnp.pad(b2, ((0, 0), (0, c2p - c2)))

    # Pad the point axis so tm always divides it (padded rows sliced off below).
    m_pad = pl.cdiv(m_total, tm) * tm
    if m_pad != m_total:
        x_smc = jnp.pad(x_smc, ((0, 0), (0, m_pad - m_total), (0, 0)))

    out = pl.pallas_call(
        _mlp_maxpool_kernel,
        out_shape=jax.ShapeDtypeStruct((m_pad, c2p), jnp.float32),
        grid_spec=pltpu.PrefetchScalarGridSpec(
            num_scalar_prefetch=0,
            grid=(m_pad // tm, nsample // ts),        # reduction (sample) axis last
            in_specs=[
                pl.BlockSpec((ts, tm, c0), lambda i, s: (s, i, 0)),
                # TODO(synk): pipeline_mode=pl.Buffered(1) on these constant weight/bias
                # blocks would give back ~one weight copy of VMEM; left at default buffering.
                pl.BlockSpec((c0, c1), lambda i, s: (0, 0)),
                pl.BlockSpec((1, c1), lambda i, s: (0, 0)),
                pl.BlockSpec((c1, c2p), lambda i, s: (0, 0)),
                pl.BlockSpec((1, c2p), lambda i, s: (0, 0)),
            ],
            # Same output block across the sample axis -> resident VMEM accumulator,
            # one HBM writeback per point tile.
            out_specs=pl.BlockSpec((tm, c2p), lambda i, s: (i, 0)),
        ),
        compiler_params=pltpu.CompilerParams(
            dimension_semantics=("parallel", "arbitrary"),
            vmem_limit_bytes=vmem_limit_bytes),
    )(x_smc, w1, b1, w2, b2)
    return out[:m_total, :c2]


# ----------------------------------------------------------------------------
# Plain-JAX glue reproducing pointnet2_utils semantics (data-dependent gathers)
# TODO(synk): at real sizes FPS / ball_query dominate wall clock; move them into
#             dedicated Pallas kernels later.
# ----------------------------------------------------------------------------
def furthest_point_sample(xyz, npoint):
    """xyz: (B, N, 3) -> (B, npoint) int32. Matches CUDA FPS (starts from index 0)."""
    N = xyz.shape[1]

    def one(x):
        def body(i, carry):
            dist, idxs, last = carry
            d = jnp.sum((x - x[last]) ** 2, axis=-1)
            dist = jnp.minimum(dist, d)
            nxt = jnp.argmax(dist).astype(jnp.int32)
            idxs = idxs.at[i].set(nxt)
            return dist, idxs, nxt

        dist0 = jnp.full((N,), 1e10, jnp.float32)
        idxs0 = jnp.zeros((npoint,), jnp.int32)
        _, idxs, _ = lax.fori_loop(1, npoint, body, (dist0, idxs0, jnp.int32(0)))
        return idxs

    return jax.vmap(one)(xyz)


def ball_query(radius, nsample, xyz, new_xyz):
    """Matches pointnet2 ball_query: first nsample in-range indices (ascending),
    padded with the first in-range index; falls back to index 0 if none in range."""
    N = xyz.shape[1]

    def per_center(center, pts):
        d2 = jnp.sum((pts - center) ** 2, axis=-1)               # (N,)
        cand = jnp.where(d2 < radius ** 2, jnp.arange(N), N)     # out of range -> N
        firsts = jnp.sort(cand)[:nsample]
        first = firsts[0]
        first = jnp.where(first < N, first, 0)                   # no neighbor -> index 0
        return jnp.where(firsts < N, firsts, first).astype(jnp.int32)

    def per_batch(centers, pts):
        return jax.vmap(lambda c: per_center(c, pts))(centers)

    return jax.vmap(per_batch)(new_xyz, xyz)


def query_and_group_sample_major(xyz, new_xyz, features, radius, nsample, use_xyz=True):
    """xyz: (B,N,3); new_xyz: (B,npoint,3); features: (B,C,N)
    -> (nsample, B, npoint, (3+)C) sample-major channels-last; channels = [rel_xyz, feats].
    The gather emits sample-major order directly (no HBM transpose of the grouped tensor)."""
    idx = ball_query(radius, nsample, xyz, new_xyz)              # (B, npoint, nsample)
    idx_s = jnp.transpose(idx, (2, 0, 1))                        # (nsample, B, npoint) int32, tiny
    gather_b = jax.vmap(lambda pts, i: pts[i])                   # per-batch row gather
    grouped_xyz = jax.vmap(lambda isl: gather_b(xyz, isl))(idx_s)          # (ns,B,np,3)
    grouped_xyz = grouped_xyz - new_xyz[None, :, :, :]                     # relative coords
    feats_nlc = jnp.transpose(features, (0, 2, 1))                         # (B, N, C)
    grouped_feats = jax.vmap(lambda isl: gather_b(feats_nlc, isl))(idx_s)  # (ns,B,np,C)
    if use_xyz:
        return jnp.concatenate([grouped_xyz, grouped_feats], axis=-1)
    return grouped_feats


# ----------------------------------------------------------------------------
# ConvBlock forward
# ----------------------------------------------------------------------------
@functools.partial(
    jax.jit,
    static_argnames=("radius", "npoint", "nsample", "use_xyz", "tm", "ts",
                     "vmem_limit_bytes"))
def conv_block_forward(xyz, features, params, *, radius, npoint, nsample,
                       use_xyz=True, tm=16, ts=8, vmem_limit_bytes=None):
    B = xyz.shape[0]
    new_idx = furthest_point_sample(xyz, npoint)                          # (B, npoint)
    new_xyz = jax.vmap(lambda p, i: p[i])(xyz, new_idx)                   # (B, npoint, 3)
    grouped = query_and_group_sample_major(xyz, new_xyz, features,
                                           radius, nsample, use_xyz)      # (ns, B, np, c0)
    c0 = grouped.shape[-1]
    # sample-major rows, channels last, bf16 matmul inputs (f32 accumulation in-kernel);
    # this reshape is a free row-major leading-dim collapse (no transpose).
    x_smc = grouped.reshape(nsample, B * npoint, c0).astype(jnp.bfloat16)
    out = mlp_maxpool(x_smc, params, tm=tm, ts=ts,
                      vmem_limit_bytes=vmem_limit_bytes)                  # (M, C_last) f32
    new_features = jnp.transpose(out.reshape(B, npoint, -1), (0, 2, 1))   # (B, C_last, npoint)
    return new_xyz, new_features


# ----------------------------------------------------------------------------
# Parameter init (Conv2d 1x1 bias=False + BatchNorm2d eval) + host-side folding
# ----------------------------------------------------------------------------
def init_params(key, mlp_list, use_xyz=True):
    chans = list(mlp_list)
    if use_xyz:
        chans[0] += 3
    # TODO(synk): kernel is specialized to len(mlp_list) == 3 (two conv/bn/relu layers);
    #             arbitrary-depth mlp_list would need a generated kernel per depth.
    assert len(chans) == 3
    params = []
    eps = 1e-5
    for i in range(len(chans) - 1):
        key, kw, kg, kb, km, kv = jax.random.split(key, 6)
        cin, cout = chans[i], chans[i + 1]
        bound = 1.0 / jnp.sqrt(jnp.float32(cin))                 # PyTorch Conv2d default init
        w = jax.random.uniform(kw, (cin, cout), jnp.float32, -bound, bound)
        gamma = jax.random.uniform(kg, (cout,), jnp.float32, 0.5, 1.5)
        beta = 0.1 * jax.random.normal(kb, (cout,), jnp.float32)
        run_mean = 0.1 * jax.random.normal(km, (cout,), jnp.float32)
        run_var = jax.random.uniform(kv, (cout,), jnp.float32, 0.5, 1.5)
        scale = gamma / jnp.sqrt(run_var + eps)                  # folded eval-mode BN
        bias = beta - run_mean * scale
        params.append((w, scale.reshape(1, cout), bias.reshape(1, cout)))
    return tuple(params)


def prepare_params(raw_params):
    """One-time host-side prep: fold BN scale into the conv weights, cast weights to bf16."""
    folded = []
    for (w, s, b) in raw_params:
        folded.append(((w * s).astype(jnp.bfloat16), b.astype(jnp.float32)))
    return tuple(folded)


if __name__ == "__main__":
    B, N, C_feat = 2, 16, 4
    npoint, nsample, radius = 8, 8, 0.4
    mlp_list = [C_feat, 16, 32]

    key = jax.random.PRNGKey(0)
    k_xyz, k_feat, k_par = jax.random.split(key, 3)
    xyz = jax.random.uniform(k_xyz, (B, N, 3), jnp.float32)              # (B, N, 3)
    features = jax.random.normal(k_feat, (B, C_feat, N), jnp.float32)    # (B, C, N)  NCHW-style
    params = prepare_params(init_params(k_par, mlp_list, use_xyz=True))

    c0, c1, c2 = mlp_list[0] + 3, mlp_list[1], mlp_list[2]
    vmem_budget, vmem_limit, two_cores = _tpu_generation()
    tm, ts = _choose_tiles(B * npoint, nsample, c0, c1, c2,
                           vmem_budget=vmem_budget, two_cores=two_cores)

    new_xyz, new_features = conv_block_forward(
        xyz, features, params, radius=radius, npoint=npoint, nsample=nsample,
        use_xyz=True, tm=tm, ts=ts, vmem_limit_bytes=vmem_limit)
    jax.block_until_ready((new_xyz, new_features))

    assert new_xyz.shape == (B, npoint, 3)
    assert new_features.shape == (B, mlp_list[-1], npoint)
    assert bool(jnp.all(jnp.isfinite(new_features)))
    print("KERNEL_OK")
</pallas_src>

<mosaic_0001>
module attributes {stable_mosaic.version = 11 : i64} {
  func.func @_mlp_maxpool_kernel(%arg0: i32, %arg1: i32, %arg2: memref<8x16x7xbf16, #tpu.memory_space<vmem>>, %arg3: memref<7x16xbf16, #tpu.memory_space<vmem>>, %arg4: memref<1x16xf32, #tpu.memory_space<vmem>>, %arg5: memref<16x128xbf16, #tpu.memory_space<vmem>>, %arg6: memref<1x128xf32, #tpu.memory_space<vmem>>, %arg7: memref<16x128xf32, #tpu.memory_space<vmem>>) attributes {dimension_semantics = [#tpu.dimension_semantics<parallel>, #tpu.dimension_semantics<arbitrary>], iteration_bounds = array<i64: 1, 1>, scalar_prefetch = 0 : i64, scratch_operands = 0 : i64, tpu.core_type = #tpu.core_type<tc>, window_params = [{transform_indices = @transform_0, window_bounds = array<i64: 8, 16, 7>}, {pipeline_mode = #tpu.pipeline_mode<synchronous>, transform_indices = @transform_1, window_bounds = array<i64: 7, 16>}, {pipeline_mode = #tpu.pipeline_mode<synchronous>, transform_indices = @transform_2, window_bounds = array<i64: 1, 16>}, {pipeline_mode = #tpu.pipeline_mode<synchronous>, transform_indices = @transform_3, window_bounds = array<i64: 16, 128>}, {pipeline_mode = #tpu.pipeline_mode<synchronous>, transform_indices = @transform_4, window_bounds = array<i64: 1, 128>}, {transform_indices = @transform_5, window_bounds = array<i64: 16, 128>}]} {
    %c0 = arith.constant 0 : index
    %c0_0 = arith.constant 0 : index
    %c0_1 = arith.constant 0 : index
    %0 = vector.load %arg2[%c0, %c0_0, %c0_1] : memref<8x16x7xbf16, #tpu.memory_space<vmem>>, vector<8x16x7xbf16>
    %1 = vector.shape_cast %0 : vector<8x16x7xbf16> to vector<128x7xbf16>
    %c0_2 = arith.constant 0 : index
    %c0_3 = arith.constant 0 : index
    %2 = vector.load %arg3[%c0_2, %c0_3] : memref<7x16xbf16, #tpu.memory_space<vmem>>, vector<7x16xbf16>
    %cst = arith.constant dense<0.000000e+00> : vector<128x16xf32>
    %3 = tpu.matmul %1, %2, %cst {dimension_numbers = #tpu.dot_dimension_numbers<[1], [0], [0], [1], [0, 0, 1, 1], [], []>} : vector<128x7xbf16>, vector<7x16xbf16>, vector<128x16xf32> -> vector<128x16xf32>
    %c0_4 = arith.constant 0 : index
    %c0_5 = arith.constant 0 : index
    %4 = vector.load %arg4[%c0_4, %c0_5] : memref<1x16xf32, #tpu.memory_space<vmem>>, vector<1x16xf32>
    %5 = vector.broadcast %4 : vector<1x16xf32> to vector<128x16xf32>
    %6 = arith.addf %3, %5 : vector<128x16xf32>
    %cst_6 = arith.constant 0.000000e+00 : f32
    %7 = vector.broadcast %cst_6 : f32 to vector<128x16xf32>
    %8 = arith.maximumf %6, %7 : vector<128x16xf32>
    %9 = arith.truncf %8 : vector<128x16xf32> to vector<128x16xbf16>
    %c0_7 = arith.constant 0 : index
    %c0_8 = arith.constant 0 : index
    %10 = vector.load %arg5[%c0_7, %c0_8] : memref<16x128xbf16, #tpu.memory_space<vmem>>, vector<16x128xbf16>
    %cst_9 = arith.constant dense<0.000000e+00> : vector<128x128xf32>
    %11 = tpu.matmul %9, %10, %cst_9 {dimension_numbers = #tpu.dot_dimension_numbers<[1], [0], [0], [1], [0, 0, 1, 1], [], []>} : vector<128x16xbf16>, vector<16x128xbf16>, vector<128x128xf32> -> vector<128x128xf32>
    %c0_10 = arith.constant 0 : index
    %c0_11 = arith.constant 0 : index
    %12 = vector.load %arg6[%c0_10, %c0_11] : memref<1x128xf32, #tpu.memory_space<vmem>>, vector<1x128xf32>
    %13 = vector.broadcast %12 : vector<1x128xf32> to vector<128x128xf32>
    %14 = arith.addf %11, %13 : vector<128x128xf32>
    %cst_12 = arith.constant 0.000000e+00 : f32
    %15 = vector.broadcast %cst_12 : f32 to vector<128x128xf32>
    %16 = arith.maximumf %14, %15 : vector<128x128xf32>
    %c0_i32 = arith.constant 0 : i32
    %17 = arith.cmpi eq, %arg1, %c0_i32 : i32
    %cst_13 = arith.constant 0.000000e+00 : f32
    %18 = vector.broadcast %cst_13 : f32 to vector<16x128xf32>
    %c0_14 = arith.constant 0 : index
    %c0_15 = arith.constant 0 : index
    %19 = vector.load %arg7[%c0_14, %c0_15] : memref<16x128xf32, #tpu.memory_space<vmem>>, vector<16x128xf32>
    %20 = arith.select %17, %18, %19 : vector<16x128xf32>
    %21 = vector.extract_strided_slice %16 {offsets = [0, 0], sizes = [16, 128], strides = [1, 1]} : vector<128x128xf32> to vector<16x128xf32>
    %22 = arith.maximumf %20, %21 : vector<16x128xf32>
    %23 = vector.extract_strided_slice %16 {offsets = [16, 0], sizes = [16, 128], strides = [1, 1]} : vector<128x128xf32> to vector<16x128xf32>
    %24 = arith.maximumf %22, %23 : vector<16x128xf32>
    %25 = vector.extract_strided_slice %16 {offsets = [32, 0], sizes = [16, 128], strides = [1, 1]} : vector<128x128xf32> to vector<16x128xf32>
    %26 = arith.maximumf %24, %25 : vector<16x128xf32>
    %27 = vector.extract_strided_slice %16 {offsets = [48, 0], sizes = [16, 128], strides = [1, 1]} : vector<128x128xf32> to vector<16x128xf32>
    %28 = arith.maximumf %26, %27 : vector<16x128xf32>
    %29 = vector.extract_strided_slice %16 {offsets = [64, 0], sizes = [16, 128], strides = [1, 1]} : vector<128x128xf32> to vector<16x128xf32>
    %30 = arith.maximumf %28, %29 : vector<16x128xf32>
    %31 = vector.extract_strided_slice %16 {offsets = [80, 0], sizes = [16, 128], strides = [1, 1]} : vector<128x128xf32> to vector<16x128xf32>
    %32 = arith.maximumf %30, %31 : vector<16x128xf32>
    %33 = vector.extract_strided_slice %16 {offsets = [96, 0], sizes = [16, 128], strides = [1, 1]} : vector<128x128xf32> to vector<16x128xf32>
    %34 = arith.maximumf %32, %33 : vector<16x128xf32>
    %35 = vector.extract_strided_slice %16 {offsets = [112, 0], sizes = [16, 128], strides = [1, 1]} : vector<128x128xf32> to vector<16x128xf32>
    %36 = arith.maximumf %34, %35 : vector<16x128xf32>
    %c0_16 = arith.constant 0 : index
    %c0_17 = arith.constant 0 : index
    %37 = vector.load %arg7[%c0_16, %c0_17] : memref<16x128xf32, #tpu.memory_space<vmem>>, vector<16x128xf32>
    tpu.vector_store %arg7[%c0_16, %c0_17], %36 {strides = array<i32>} : memref<16x128xf32, #tpu.memory_space<vmem>>, vector<16x128xf32>,
    return
  }
  func.func @transform_0(%arg0: i32, %arg1: i32) -> (i32, i32, i32) {
    %c0_i32 = arith.constant 0 : i32
    %c0_i32_0 = arith.constant 0 : i32
    return %arg1, %arg0, %c0_i32 : i32, i32, i32
  }
  func.func @transform_1(%arg0: i32, %arg1: i32) -> (i32, i32) {
    %c0_i32 = arith.constant 0 : i32
    %c0_i32_0 = arith.constant 0 : i32
    %c0_i32_1 = arith.constant 0 : i32
    return %c0_i32, %c0_i32_0 : i32, i32
  }
  func.func @transform_2(%arg0: i32, %arg1: i32) -> (i32, i32) {
    %c0_i32 = arith.constant 0 : i32
    %c0_i32_0 = arith.constant 0 : i32
    %c0_i32_1 = arith.constant 0 : i32
    return %c0_i32, %c0_i32_0 : i32, i32
  }
  func.func @transform_3(%arg0: i32, %arg1: i32) -> (i32, i32) {
    %c0_i32 = arith.constant 0 : i32
    %c0_i32_0 = arith.constant 0 : i32
    %c0_i32_1 = arith.constant 0 : i32
    return %c0_i32, %c0_i32_0 : i32, i32
  }
  func.func @transform_4(%arg0: i32, %arg1: i32) -> (i32, i32) {
    %c0_i32 = arith.constant 0 : i32
    %c0_i32_0 = arith.constant 0 : i32
    %c0_i32_1 = arith.constant 0 : i32
    return %c0_i32, %c0_i32_0 : i32, i32
  }
  func.func @transform_5(%arg0: i32, %arg1: i32) -> (i32, i32) {
    %c0_i32 = arith.constant 0 : i32
    %c0_i32_0 = arith.constant 0 : i32
    return %arg0, %c0_i32 : i32, i32
  }
}

</mosaic_0001>

<bundles_post_ra>
// kernel: custom-call.8
= control target key start
LH: loop header
LB: loop body
LE: loop exit
PB: predicated region body
PF: predicated region fallthrough
CT: control target
= control target key end

     0   :  { %s6_s0 = inlined_call_operand.vmem [shape: f32[2,16], index: 0, kind: output, shape index: {}]  }

// kernel: conv_block_forward.1
= control target key start
LH: loop header
LB: loop body
LE: loop exit
PB: predicated region body
PF: predicated region fallthrough
CT: control target
= control target key end

     0   :  { %vm107_vm0 = vcmask 1042432   ;;  %vm108_vm1 = vcmask 1043456   ;;  %v385_v1 = vmov 65535   ;;  %vm82_vm2 = vcmask 56320   ;;  %s466_s1 = inlined_call_operand.vmem [shape: bf16[7,16], index: 1, kind: input, shape index: {}]   ;;  %s467_s0 = inlined_call_operand.vmem [shape: bf16[8,16,7], index: 0, kind: input, shape index: {}]   ;;  %s468_s2 = inlined_call_operand.vmem [shape: f32[1,16], index: 2, kind: input, shape index: {}]   ;;  %s469_s4 = inlined_call_operand.vmem [shape: f32[1,128], index: 4, kind: input, shape index: {}]   ;;  %s470_s3 = inlined_call_operand.vmem [shape: bf16[16,128], index: 3, kind: input, shape index: {}]   ;;  %s471_s5 = inlined_call_operand.vmem [shape: f32[16,128], index: 5, kind: output, shape index: {}]  }
   0x1   :  { %v37_v0 = vld [vmem:[%s466_s1] sm:$0xf]  ;;  %v109_v2 = vsel %vm107_vm0, 4294967295, %v385_v1  ;;  %v372_v7 = vld [vmem:[%s467_s0 + $0x8] sm:$0xff]  ;;  %v373_v9 = vld [vmem:[%s467_s0 + $0x10] sm:$0xff]  ;;  %vm199_vm3 = vcmask 130048  }
   0x2   :  { %v110_v3 = vsel %vm108_vm1, %v109_v2, 0  ;;  %v371_v5 = vld [vmem:[%s467_s0] sm:$0xff]  ;;  %v376_v8 = vld [vmem:[%s467_s0 + $0x28] sm:$0xff]  ;;  %v377_v10 = vld [vmem:[%s467_s0 + $0x30] sm:$0xff] }
   0x3   :  { %v112_v4 = vand.u32 %v110_v3, %v37_v0  ;;  %v375_v6 = vld [vmem:[%s467_s0 + $0x20] sm:$0xff]  ;;  %v374_v11 = vld [vmem:[%s467_s0 + $0x18] sm:$0xff] }
   0x4   :  { %v378_v12 = vld [vmem:[%s467_s0 + $0x38] sm:$0xff]  ;;  %v379_v13 = vld [vmem:[%s470_s3] sm:$0xff] }
   0x5   :  { %121 = vmatpush.bf16.msra.mxu0 %v112_v4  ;;  %380 = vmatpush.bf16.msra.mxu2 %v112_v4  ;;  %v383_v15 = vld [vmem:[%s468_s2] ss:$0 sm:$0xff] }
   0x6   :  { %231 = vmatpush.bf16.msra.mxu1 %v379_v13  ;;  %381 = vmatpush.bf16.msra.mxu3 %v379_v13 }
   0x8   :  { %351 = vmatmul.msk.bf16.vlgmr.msra.gmra.mxu0 %vm82_vm2, %v371_v5  ;;  %355 = vmatmul.msk.bf16.vlgmr.msra.gmra.mxu2 %vm82_vm2, %v375_v6 }
  0x18   :  { %352 = vmatmul.msk.bf16.gmra.mxu0 %vm82_vm2, %v372_v7  ;;  %356 = vmatmul.msk.bf16.gmra.mxu2 %vm82_vm2, %v376_v8 }
  0x28   :  { %353 = vmatmul.msk.bf16.gmra.mxu0 %vm82_vm2, %v373_v9  ;;  %357 = vmatmul.msk.bf16.gmra.mxu2 %vm82_vm2, %v377_v10 }
  0x38   :  { %354 = vmatmul.msk.bf16.gmra.mxu0 %vm82_vm2, %v374_v11  ;;  %358 = vmatmul.msk.bf16.gmra.mxu2 %vm82_vm2, %v378_v12 }
  0x85   :  { %v123_v14 = vpop.f32.mrf.mxu0 }
  0x86   :  { %v124_v17 = vadd.f32 %v383_v15, %v123_v14 }
  0x88   :  { %v163_v20 = vmax.f32 %v124_v17, 0.0 }
  0x8b   :  { %v143_v16 = vpop.f32.mrf.mxu2 }
  0x8c   :  { %v144_v22 = vadd.f32 %v383_v15, %v143_v16  ;;  %v384_v16 = vld [vmem:[%s469_s4] ss:$0 sm:$0xff] }
  0x8d   :  { %v125_v18 = vpop.f32.mrf.mxu0 }
  0x8e   :  { %v126_v19 = vadd.f32 %v383_v15, %v125_v18  ;;  %v171_v27 = vmax.f32 %v144_v22, 0.0 }
  0x90   :  { %v164_v21 = vmax.f32 %v126_v19, 0.0 }
  0x92   :  { %v179_v23 = vpack.c.bf16 %v164_v21, %v163_v20 }
  0x93   :  { %v145_v24 = vpop.f32.mrf.mxu2 }
  0x94   :  { %v146_v25 = vadd.f32 %v383_v15, %v145_v24  ;;  %363 = vmatmul.msk.bf16.vlgmr.msra.gmra.mxu1 %vm199_vm3, %v179_v23 }
  0x95   :  { %v128_v26 = vpop.f32.mrf.mxu0 }
  0x96   :  { %v172_v28 = vmax.f32 %v146_v25, 0.0  ;;  %v129_v31 = vadd.f32 %v383_v15, %v128_v26 }
  0x98   :  { %v183_v29 = vpack.c.bf16 %v172_v28, %v171_v27  ;;  %v165_v34 = vmax.f32 %v129_v31, 0.0 }
  0x9a   :  { %367 = vmatmul.msk.bf16.vlgmr.msra.gmra.mxu3 %vm199_vm3, %v183_v29 }
  0x9b   :  { %v148_v30 = vpop.f32.mrf.mxu2 }
  0x9c   :  { %v149_v36 = vadd.f32 %v383_v15, %v148_v30 }
  0x9d   :  { %v130_v32 = vpop.f32.mrf.mxu0 }
  0x9e   :  { %v131_v33 = vadd.f32 %v383_v15, %v130_v32  ;;  %v173_v41 = vmax.f32 %v149_v36, 0.0 }
  0xa0   :  { %v166_v35 = vmax.f32 %v131_v33, 0.0 }
  0xa2   :  { %v180_v37 = vpack.c.bf16 %v166_v35, %v165_v34 }
  0xa3   :  { %v150_v38 = vpop.f32.mrf.mxu2 }
  0xa4   :  { %v151_v39 = vadd.f32 %v383_v15, %v150_v38  ;;  %364 = vmatmul.msk.bf16.gmra.mxu1 %vm199_vm3, %v180_v37 }
  0xa5   :  { %v133_v40 = vpop.f32.mrf.mxu0 }
  0xa6   :  { %v174_v42 = vmax.f32 %v151_v39, 0.0  ;;  %v134_v45 = vadd.f32 %v383_v15, %v133_v40 }
  0xa8   :  { %v184_v43 = vpack.c.bf16 %v174_v42, %v173_v41  ;;  %v167_v48 = vmax.f32 %v134_v45, 0.0 }
  0xaa   :  { %368 = vmatmul.msk.bf16.gmra.mxu3 %vm199_vm3, %v184_v43 }
  0xab   :  { %v153_v44 = vpop.f32.mrf.mxu2 }
  0xac   :  { %v154_v50 = vadd.f32 %v383_v15, %v153_v44 }
  0xad   :  { %v135_v46 = vpop.f32.mrf.mxu0 }
  0xae   :  { %v136_v47 = vadd.f32 %v383_v15, %v135_v46  ;;  %v175_v55 = vmax.f32 %v154_v50, 0.0 }
  0xb0   :  { %v168_v49 = vmax.f32 %v136_v47, 0.0 }
  0xb2   :  { %v181_v51 = vpack.c.bf16 %v168_v49, %v167_v48 }
  0xb3   :  { %v155_v52 = vpop.f32.mrf.mxu2 }
  0xb4   :  { %v156_v53 = vadd.f32 %v383_v15, %v155_v52  ;;  %365 = vmatmul.msk.bf16.gmra.mxu1 %vm199_vm3, %v181_v51 }
  0xb5   :  { %v138_v54 = vpop.f32.mrf.mxu0 }
  0xb6   :  { %v176_v56 = vmax.f32 %v156_v53, 0.0  ;;  %v139_v59 = vadd.f32 %v383_v15, %v138_v54 }
  0xb8   :  { %v185_v57 = vpack.c.bf16 %v176_v56, %v175_v55  ;;  %v169_v62 = vmax.f32 %v139_v59, 0.0 }
  0xba   :  { %369 = vmatmul.msk.bf16.gmra.mxu3 %vm199_vm3, %v185_v57 }
  0xbb   :  { %v158_v58 = vpop.f32.mrf.mxu2 }
  0xbc   :  { %v159_v0 = vadd.f32 %v383_v15, %v158_v58 }
  0xbd   :  { %v140_v60 = vpop.f32.mrf.mxu0 }
  0xbe   :  { %v141_v61 = vadd.f32 %v383_v15, %v140_v60  ;;  %v177_v4 = vmax.f32 %v159_v0, 0.0 }
  0xc0   :  { %v170_v63 = vmax.f32 %v141_v61, 0.0 }
  0xc2   :  { %v182_v1 = vpack.c.bf16 %v170_v63, %v169_v62 }
  0xc3   :  { %v160_v2 = vpop.f32.mrf.mxu2 }
  0xc4   :  { %v161_v3 = vadd.f32 %v383_v15, %v160_v2  ;;  %366 = vmatmul.msk.bf16.gmra.mxu1 %vm199_vm3, %v182_v1 }
  0xc6   :  { %v178_v5 = vmax.f32 %v161_v3, 0.0 }
  0xc8   :  { %v186_v6 = vpack.c.bf16 %v178_v5, %v177_v4 }
  0xca   :  { %370 = vmatmul.msk.bf16.gmra.mxu3 %vm199_vm3, %v186_v6 }
 0x111   :  { %v233_v7 = vpop.f32.mrf.mxu1 }
 0x112   :  { %v234_v17 = vadd.f32 %v384_v16, %v233_v7 }
 0x114   :  { %v273_v20 = vmax.f32 %v234_v17, 0.0 }
 0x116   :  { %v297_v24 = vmax.f32 %v273_v20, 0.0 }
 0x119   :  { %v235_v8 = vpop.f32.mrf.mxu1 }
 0x11a   :  { %v236_v25 = vadd.f32 %v384_v16, %v235_v8 }
 0x11c   :  { %v274_v32 = vmax.f32 %v236_v25, 0.0 }
 0x11d   :  { %v253_v9 = vpop.f32.mrf.mxu3 }
 0x11e   :  { %v254_v28 = vadd.f32 %v384_v16, %v253_v9  ;;  %v298_v41 = vmax.f32 %v274_v32, 0.0 }
 0x120   :  { %v281_v37 = vmax.f32 %v254_v28, 0.0 }
 0x121   :  { %v238_v10 = vpop.f32.mrf.mxu1 }
 0x122   :  { %v239_v19 = vadd.f32 %v384_v16, %v238_v10 }
 0x124   :  { %v275_v23 = vmax.f32 %v239_v19, 0.0 }
 0x125   :  { %v255_v11 = vpop.f32.mrf.mxu3 }
 0x126   :  { %v299_v29 = vmax.f32 %v297_v24, %v275_v23  ;;  %v256_v44 = vadd.f32 %v384_v16, %v255_v11 }
 0x128   :  { %v282_v53 = vmax.f32 %v256_v44, 0.0 }
 0x129   :  { %v240_v12 = vpop.f32.mrf.mxu1 }
 0x12a   :  { %v241_v30 = vadd.f32 %v384_v16, %v240_v12 }
 0x12c   :  { %v276_v38 = vmax.f32 %v241_v30, 0.0 }
 0x12d   :  { %v258_v13 = vpop.f32.mrf.mxu3 }
 0x12e   :  { %v259_v39 = vadd.f32 %v384_v16, %v258_v13  ;;  %v300_v46 = vmax.f32 %v298_v41, %v276_v38 }
 0x130   :  { %v283_v47 = vmax.f32 %v259_v39, 0.0 }
 0x131   :  { %v243_v14 = vpop.f32.mrf.mxu1 }
 0x132   :  { %v244_v21 = vadd.f32 %v384_v16, %v243_v14 }
 0x134   :  { %v277_v26 = vmax.f32 %v244_v21, 0.0 }
 0x135   :  { %v260_v15 = vpop.f32.mrf.mxu3 }
 0x136   :  { %v301_v33 = vmax.f32 %v299_v29, %v277_v26  ;;  %v261_v55 = vadd.f32 %v384_v16, %v260_v15 }
 0x138   :  { %v284_v62 = vmax.f32 %v261_v55, 0.0 }
 0x139   :  { %v245_v18 = vpop.f32.mrf.mxu1 }
 0x13a   :  { %v246_v34 = vadd.f32 %v384_v16, %v245_v18 }
 0x13c   :  { %v278_v42 = vmax.f32 %v246_v34, 0.0 }
 0x13d   :  { %v263_v22 = vpop.f32.mrf.mxu3 }
 0x13e   :  { %v264_v48 = vadd.f32 %v384_v16, %v263_v22  ;;  %v302_v50 = vmax.f32 %v300_v46, %v278_v42 }
 0x140   :  { %v285_v56 = vmax.f32 %v264_v48, 0.0 }
 0x141   :  { %v248_v27 = vpop.f32.mrf.mxu1 }
 0x142   :  { %v249_v31 = vadd.f32 %v384_v16, %v248_v27 }
 0x144   :  { %v279_v35 = vmax.f32 %v249_v31, 0.0 }
 0x145   :  { %v265_v36 = vpop.f32.mrf.mxu3 }
 0x146   :  { %v303_v40 = vmax.f32 %v301_v33, %v279_v35  ;;  %v266_v63 = vadd.f32 %v384_v16, %v265_v36 }
 0x148   :  { %v305_v43 = vmax.f32 %v303_v40, %v281_v37  ;;  %v286_v3 = vmax.f32 %v266_v63, 0.0 }
 0x149   :  { %v250_v45 = vpop.f32.mrf.mxu1 }
 0x14a   :  { %v251_v49 = vadd.f32 %v384_v16, %v250_v45  ;;  %v307_v52 = vmax.f32 %v305_v43, %v283_v47 }
 0x14c   :  { %v280_v51 = vmax.f32 %v251_v49, 0.0  ;;  %v309_v61 = vmax.f32 %v307_v52, %v285_v56 }
 0x14d   :  { %v268_v54 = vpop.f32.mrf.mxu3 }
 0x14e   :  { %v304_v57 = vmax.f32 %v302_v50, %v280_v51  ;;  %v269_v58 = vadd.f32 %v384_v16, %v268_v54 }
 0x150   :  { %v306_v59 = vmax.f32 %v304_v57, %v282_v53  ;;  %v287_v60 = vmax.f32 %v269_v58, 0.0 }
 0x152   :  { %v311_v0 = vmax.f32 %v309_v61, %v287_v60  ;;  %v308_v1 = vmax.f32 %v306_v59, %v284_v62 }
 0x154   :  { %313 = vst [vmem:[%s471_s5] sm:$0xff] %v311_v0  ;;  %v310_v6 = vmax.f32 %v308_v1, %v286_v3 }
 0x155   :  { %v270_v2 = vpop.f32.mrf.mxu3 }
 0x156   :  { %v271_v4 = vadd.f32 %v384_v16, %v270_v2 }
 0x158   :  { %v288_v5 = vmax.f32 %v271_v4, 0.0 }
 0x15a   :  { %v312_v7 = vmax.f32 %v310_v6, %v288_v5 }
 0x15c   :  { %314 = vst [vmem:[%s471_s5 + $0x8] sm:$0xff] %v312_v7 }

</bundles_post_ra>
